<compile_context>
chip_gen: v7x
topology: tpu7x:2x2x1
jax: 0.10.0
libtpu: 0.0.40
codegen_flags: <defaults>
</compile_context>

<pallas_src>
import jax
import jax.numpy as jnp
from jax.experimental import pallas as pl
from jax.experimental.pallas import tpu as pltpu


def _conf_maxpool_kernel(x_ref, c_ref, x_out, c_out):
    # x_ref, c_ref : (TB, 2W)  lanes [0,W) = window row 0, lanes [W,2W) = window row 1
    # x_out, c_out : (TB, Wo)  with Wo = W // 2
    two_w = x_ref.shape[-1]
    W = two_w // 2
    Wo = x_out.shape[-1]
    f32 = jnp.float32

    x = x_ref[...].astype(f32)
    c = c_ref[...].astype(f32)

    def shl(v, s):
        # lane i <- lane i + s (circular).  Wrapped lanes are never selected.
        # Unambiguous (jnp.roll(v, -s) equivalent); lowers to lane rotate+select.
        return jnp.concatenate([v[:, s:], v[:, :s]], axis=-1)

    # --- 1) column-pair reduction (both window rows at once) ------------------
    # Strict '>' keeps the LEFT column on ties -> first max in raster order,
    # matching F.max_pool2d's returned indices.
    # NOTE: NaN confidences are only propagated if they sit at corner (0,0);
    # torch.max_pool2d would propagate any NaN.  Same behavior as v1/v2.
    c_nbr, x_nbr = shl(c, 1), shl(x, 1)
    take = c_nbr > c
    c_col = jnp.where(take, c_nbr, c)        # valid at even lanes of both halves
    x_col = jnp.where(take, x_nbr, x)

    # --- 2) row-pair reduction (window row 0 wins ties) -----------------------
    c_r1, x_r1 = shl(c_col, W), shl(x_col, W)
    take = c_r1 > c_col
    c_win = jnp.where(take, c_r1, c_col)     # valid at even lanes of [0, W)
    x_win = jnp.where(take, x_r1, x_col)

    # --- 3) compact even lanes of [0,W) into [0,Wo) ---------------------------
    # Log-step unzip: after steps 0..k-1 element j sits at lane 2j - (j mod 2^k);
    # at step k lanes with (bit k == 1, bit k+1 == 0) pull from lane+2^k.
    # ceil(log2(Wo)) shift+select pairs per array, VPU/XLU only.
    lane = jax.lax.broadcasted_iota(jnp.int32, (1, two_w), 1)
    k = 0
    while (1 << k) < Wo:
        s = 1 << k
        move_to = (((lane >> k) & 1) == 1) & (((lane >> (k + 1)) & 1) == 0)
        c_win = jnp.where(move_to, shl(c_win, s), c_win)
        x_win = jnp.where(move_to, shl(x_win, s), x_win)
        k += 1

    c_out[...] = (c_win[:, :Wo] * 0.25).astype(c_out.dtype)   # c_ds /= 4
    x_out[...] = x_win[:, :Wo].astype(x_out.dtype)            # x at c's argmax


def _round_up(a, b):
    return (a + b - 1) // b * b


def conf_max_pool(x, c, kernel_size=(2, 2)):
    if isinstance(kernel_size, int):
        kernel_size = (kernel_size, kernel_size)
    assert tuple(kernel_size) == (2, 2), "implemented for 2x2 / stride-2 pooling"
    assert x.shape == c.shape
    N, C, H, W = x.shape
    assert H % 2 == 0 and W % 2 == 0, "floor-mode pooling with odd H/W not supported"
    Ho, Wo = H // 2, W // 2
    R = N * C * Ho                      # one kernel row per output (n, c, i) row

    # Pure row-major reshape (no HBM data movement): row r holds input rows
    # 2r (lanes [0,W)) and 2r+1 (lanes [W,2W)).
    xr = x.reshape(R, 2 * W)
    cr = c.reshape(R, 2 * W)

    # ---- rows per grid step (tb), sized against the PADDED VMEM footprint ----
    itemsize = jnp.dtype(x.dtype).itemsize
    lanes_in = _round_up(2 * W, 128)
    lanes_out = _round_up(Wo, 128)
    io_bytes_row = (2 * lanes_in + 2 * lanes_out) * itemsize * 2   # double-buffered I/O
    tmp_bytes_row = 8 * lanes_in * 4                               # in-kernel f32 temps (est.)
    row_bytes = io_bytes_row + tmp_bytes_row

    budget = 20 * 1024 * 1024            # per-step target, well under the limit below
    if R <= 8:
        tb = R                           # single full-extent block
    else:
        tb = max(8, (budget // row_bytes) // 8 * 8)
        # Keep >= 4 grid steps when possible: both v7x TensorCores get work and
        # the input/output DMAs have iterations to pipeline against.
        if R >= 32:
            tb = min(tb, max(8, (R // 4) // 8 * 8))
        elif R >= 16:
            tb = min(tb, max(8, (R // 2) // 8 * 8))
        tb = min(tb, (R // 8) * 8)

    grid = (pl.cdiv(R, tb),)

    in_spec = pl.BlockSpec((tb, 2 * W), lambda i: (i, 0))
    # TODO(synk): for very small Wo (<128) the output stores are lane-masked; if
    # that ever dominates, fold several output rows into the lane dim wrapper-side.
    out_spec = pl.BlockSpec((tb, Wo), lambda i: (i, 0))

    bytes_accessed = int((xr.size + cr.size + 2 * R * Wo) * itemsize)
    flops = int(12 * R * 2 * W)          # compares/selects, rough

    x_ds, c_ds = pl.pallas_call(
        _conf_maxpool_kernel,
        grid=grid,
        in_specs=[in_spec, in_spec],
        out_specs=[out_spec, out_spec],
        out_shape=(jax.ShapeDtypeStruct((R, Wo), x.dtype),
                   jax.ShapeDtypeStruct((R, Wo), c.dtype)),
        compiler_params=pltpu.CompilerParams(
            dimension_semantics=("parallel",),
            vmem_limit_bytes=40 * 1024 * 1024,
        ),
        cost_estimate=pl.CostEstimate(flops=flops, transcendentals=0,
                                      bytes_accessed=bytes_accessed),
    )(xr, cr)

    return x_ds.reshape(N, C, Ho, Wo), c_ds.reshape(N, C, Ho, Wo)


def _reference(x, c):
    """Pure-JAX reference of the PyTorch forward (for verification)."""
    N, C, H, W = x.shape
    Ho, Wo = H // 2, W // 2
    # windows in raster order (00, 01, 10, 11)
    cw = c.reshape(N, C, Ho, 2, Wo, 2).transpose(0, 1, 2, 4, 3, 5).reshape(N, C, Ho, Wo, 4)
    xw = x.reshape(N, C, Ho, 2, Wo, 2).transpose(0, 1, 2, 4, 3, 5).reshape(N, C, Ho, Wo, 4)
    idx = jnp.argmax(cw, axis=-1)          # first max wins ties, like max_pool2d
    c_ds = jnp.max(cw, axis=-1) / 4.0
    x_ds = jnp.take_along_axis(xw, idx[..., None], axis=-1)[..., 0]
    return x_ds, c_ds


if __name__ == "__main__":
    key = jax.random.PRNGKey(0)
    kx, kc = jax.random.split(key)
    N, C, H, W = 2, 4, 16, 16
    x = jax.random.normal(kx, (N, C, H, W), dtype=jnp.float32)
    c = jax.random.uniform(kc, (N, C, H, W), dtype=jnp.float32)  # confidences

    x_ds, c_ds = conf_max_pool(x, c, kernel_size=(2, 2))
    jax.block_until_ready((x_ds, c_ds))

    x_ref, c_ref = _reference(x, c)
    assert x_ds.shape == (N, C, H // 2, W // 2) and c_ds.shape == (N, C, H // 2, W // 2)
    assert jnp.allclose(x_ds, x_ref, atol=1e-5, rtol=1e-5)
    assert jnp.allclose(c_ds, c_ref, atol=1e-5, rtol=1e-5)

    print("KERNEL_OK")
</pallas_src>

<mosaic_0001>
module attributes {stable_mosaic.version = 11 : i64} {
  func.func @_conf_maxpool_kernel(%arg0: i32, %arg1: memref<16x32xf32, #tpu.memory_space<vmem>>, %arg2: memref<16x32xf32, #tpu.memory_space<vmem>>, %arg3: memref<16x8xf32, #tpu.memory_space<vmem>>, %arg4: memref<16x8xf32, #tpu.memory_space<vmem>>) attributes {dimension_semantics = [#tpu.dimension_semantics<parallel>], iteration_bounds = array<i64: 4>, scalar_prefetch = 0 : i64, scratch_operands = 0 : i64, tpu.core_type = #tpu.core_type<tc>, window_params = [{transform_indices = @transform_0, window_bounds = array<i64: 16, 32>}, {transform_indices = @transform_1, window_bounds = array<i64: 16, 32>}, {transform_indices = @transform_2, window_bounds = array<i64: 16, 8>}, {transform_indices = @transform_3, window_bounds = array<i64: 16, 8>}]} {
    %c0 = arith.constant 0 : index
    %c0_0 = arith.constant 0 : index
    %0 = vector.load %arg1[%c0, %c0_0] : memref<16x32xf32, #tpu.memory_space<vmem>>, vector<16x32xf32>
    %c0_1 = arith.constant 0 : index
    %c0_2 = arith.constant 0 : index
    %1 = vector.load %arg2[%c0_1, %c0_2] : memref<16x32xf32, #tpu.memory_space<vmem>>, vector<16x32xf32>
    %2 = vector.extract_strided_slice %1 {offsets = [0, 1], sizes = [16, 31], strides = [1, 1]} : vector<16x32xf32> to vector<16x31xf32>
    %3 = vector.extract_strided_slice %1 {offsets = [0, 0], sizes = [16, 1], strides = [1, 1]} : vector<16x32xf32> to vector<16x1xf32>
    %4 = tpu.concatenate %2, %3 in 1 : vector<16x31xf32>, vector<16x1xf32> -> vector<16x32xf32>
    %5 = vector.extract_strided_slice %0 {offsets = [0, 1], sizes = [16, 31], strides = [1, 1]} : vector<16x32xf32> to vector<16x31xf32>
    %6 = vector.extract_strided_slice %0 {offsets = [0, 0], sizes = [16, 1], strides = [1, 1]} : vector<16x32xf32> to vector<16x1xf32>
    %7 = tpu.concatenate %5, %6 in 1 : vector<16x31xf32>, vector<16x1xf32> -> vector<16x32xf32>
    %8 = arith.cmpf ogt, %4, %1 : vector<16x32xf32>
    %9 = arith.select %8, %4, %1 : vector<16x32xi1>, vector<16x32xf32>
    %10 = arith.select %8, %7, %0 : vector<16x32xi1>, vector<16x32xf32>
    %11 = vector.extract_strided_slice %9 {offsets = [0, 16], sizes = [16, 16], strides = [1, 1]} : vector<16x32xf32> to vector<16x16xf32>
    %12 = vector.extract_strided_slice %9 {offsets = [0, 0], sizes = [16, 16], strides = [1, 1]} : vector<16x32xf32> to vector<16x16xf32>
    %13 = tpu.concatenate %11, %12 in 1 : vector<16x16xf32>, vector<16x16xf32> -> vector<16x32xf32>
    %14 = vector.extract_strided_slice %10 {offsets = [0, 16], sizes = [16, 16], strides = [1, 1]} : vector<16x32xf32> to vector<16x16xf32>
    %15 = vector.extract_strided_slice %10 {offsets = [0, 0], sizes = [16, 16], strides = [1, 1]} : vector<16x32xf32> to vector<16x16xf32>
    %16 = tpu.concatenate %14, %15 in 1 : vector<16x16xf32>, vector<16x16xf32> -> vector<16x32xf32>
    %17 = arith.cmpf ogt, %13, %9 : vector<16x32xf32>
    %18 = arith.select %17, %13, %9 : vector<16x32xi1>, vector<16x32xf32>
    %19 = arith.select %17, %16, %10 : vector<16x32xi1>, vector<16x32xf32>
    %20 = tpu.iota {dimensions = array<i32: 1>} : vector<1x32xi32>
    %c0_i32 = arith.constant 0 : i32
    %21 = vector.broadcast %c0_i32 : i32 to vector<1x32xi32>
    %22 = arith.shrsi %20, %21 : vector<1x32xi32>
    %c1_i32 = arith.constant 1 : i32
    %23 = vector.broadcast %c1_i32 : i32 to vector<1x32xi32>
    %24 = arith.andi %22, %23 : vector<1x32xi32>
    %c1_i32_3 = arith.constant 1 : i32
    %25 = vector.broadcast %c1_i32_3 : i32 to vector<1x32xi32>
    %26 = arith.cmpi eq, %24, %25 : vector<1x32xi32>
    %c1_i32_4 = arith.constant 1 : i32
    %27 = vector.broadcast %c1_i32_4 : i32 to vector<1x32xi32>
    %28 = arith.shrsi %20, %27 : vector<1x32xi32>
    %c1_i32_5 = arith.constant 1 : i32
    %29 = vector.broadcast %c1_i32_5 : i32 to vector<1x32xi32>
    %30 = arith.andi %28, %29 : vector<1x32xi32>
    %c0_i32_6 = arith.constant 0 : i32
    %31 = vector.broadcast %c0_i32_6 : i32 to vector<1x32xi32>
    %32 = arith.cmpi eq, %30, %31 : vector<1x32xi32>
    %33 = arith.andi %26, %32 : vector<1x32xi1>
    %34 = vector.extract_strided_slice %18 {offsets = [0, 1], sizes = [16, 31], strides = [1, 1]} : vector<16x32xf32> to vector<16x31xf32>
    %35 = vector.extract_strided_slice %18 {offsets = [0, 0], sizes = [16, 1], strides = [1, 1]} : vector<16x32xf32> to vector<16x1xf32>
    %36 = tpu.concatenate %34, %35 in 1 : vector<16x31xf32>, vector<16x1xf32> -> vector<16x32xf32>
    %37 = vector.shape_cast %33 : vector<1x32xi1> to vector<1x32xi1>
    %38 = vector.broadcast %37 : vector<1x32xi1> to vector<16x32xi1>
    %39 = arith.select %38, %36, %18 : vector<16x32xi1>, vector<16x32xf32>
    %40 = vector.extract_strided_slice %19 {offsets = [0, 1], sizes = [16, 31], strides = [1, 1]} : vector<16x32xf32> to vector<16x31xf32>
    %41 = vector.extract_strided_slice %19 {offsets = [0, 0], sizes = [16, 1], strides = [1, 1]} : vector<16x32xf32> to vector<16x1xf32>
    %42 = tpu.concatenate %40, %41 in 1 : vector<16x31xf32>, vector<16x1xf32> -> vector<16x32xf32>
    %43 = vector.shape_cast %33 : vector<1x32xi1> to vector<1x32xi1>
    %44 = vector.broadcast %43 : vector<1x32xi1> to vector<16x32xi1>
    %45 = arith.select %44, %42, %19 : vector<16x32xi1>, vector<16x32xf32>
    %c1_i32_7 = arith.constant 1 : i32
    %46 = vector.broadcast %c1_i32_7 : i32 to vector<1x32xi32>
    %47 = arith.shrsi %20, %46 : vector<1x32xi32>
    %c1_i32_8 = arith.constant 1 : i32
    %48 = vector.broadcast %c1_i32_8 : i32 to vector<1x32xi32>
    %49 = arith.andi %47, %48 : vector<1x32xi32>
    %c1_i32_9 = arith.constant 1 : i32
    %50 = vector.broadcast %c1_i32_9 : i32 to vector<1x32xi32>
    %51 = arith.cmpi eq, %49, %50 : vector<1x32xi32>
    %c2_i32 = arith.constant 2 : i32
    %52 = vector.broadcast %c2_i32 : i32 to vector<1x32xi32>
    %53 = arith.shrsi %20, %52 : vector<1x32xi32>
    %c1_i32_10 = arith.constant 1 : i32
    %54 = vector.broadcast %c1_i32_10 : i32 to vector<1x32xi32>
    %55 = arith.andi %53, %54 : vector<1x32xi32>
    %c0_i32_11 = arith.constant 0 : i32
    %56 = vector.broadcast %c0_i32_11 : i32 to vector<1x32xi32>
    %57 = arith.cmpi eq, %55, %56 : vector<1x32xi32>
    %58 = arith.andi %51, %57 : vector<1x32xi1>
    %59 = vector.extract_strided_slice %39 {offsets = [0, 2], sizes = [16, 30], strides = [1, 1]} : vector<16x32xf32> to vector<16x30xf32>
    %60 = vector.extract_strided_slice %39 {offsets = [0, 0], sizes = [16, 2], strides = [1, 1]} : vector<16x32xf32> to vector<16x2xf32>
    %61 = tpu.concatenate %59, %60 in 1 : vector<16x30xf32>, vector<16x2xf32> -> vector<16x32xf32>
    %62 = vector.shape_cast %58 : vector<1x32xi1> to vector<1x32xi1>
    %63 = vector.broadcast %62 : vector<1x32xi1> to vector<16x32xi1>
    %64 = arith.select %63, %61, %39 : vector<16x32xi1>, vector<16x32xf32>
    %65 = vector.extract_strided_slice %45 {offsets = [0, 2], sizes = [16, 30], strides = [1, 1]} : vector<16x32xf32> to vector<16x30xf32>
    %66 = vector.extract_strided_slice %45 {offsets = [0, 0], sizes = [16, 2], strides = [1, 1]} : vector<16x32xf32> to vector<16x2xf32>
    %67 = tpu.concatenate %65, %66 in 1 : vector<16x30xf32>, vector<16x2xf32> -> vector<16x32xf32>
    %68 = vector.shape_cast %58 : vector<1x32xi1> to vector<1x32xi1>
    %69 = vector.broadcast %68 : vector<1x32xi1> to vector<16x32xi1>
    %70 = arith.select %69, %67, %45 : vector<16x32xi1>, vector<16x32xf32>
    %c2_i32_12 = arith.constant 2 : i32
    %71 = vector.broadcast %c2_i32_12 : i32 to vector<1x32xi32>
    %72 = arith.shrsi %20, %71 : vector<1x32xi32>
    %c1_i32_13 = arith.constant 1 : i32
    %73 = vector.broadcast %c1_i32_13 : i32 to vector<1x32xi32>
    %74 = arith.andi %72, %73 : vector<1x32xi32>
    %c1_i32_14 = arith.constant 1 : i32
    %75 = vector.broadcast %c1_i32_14 : i32 to vector<1x32xi32>
    %76 = arith.cmpi eq, %74, %75 : vector<1x32xi32>
    %c3_i32 = arith.constant 3 : i32
    %77 = vector.broadcast %c3_i32 : i32 to vector<1x32xi32>
    %78 = arith.shrsi %20, %77 : vector<1x32xi32>
    %c1_i32_15 = arith.constant 1 : i32
    %79 = vector.broadcast %c1_i32_15 : i32 to vector<1x32xi32>
    %80 = arith.andi %78, %79 : vector<1x32xi32>
    %c0_i32_16 = arith.constant 0 : i32
    %81 = vector.broadcast %c0_i32_16 : i32 to vector<1x32xi32>
    %82 = arith.cmpi eq, %80, %81 : vector<1x32xi32>
    %83 = arith.andi %76, %82 : vector<1x32xi1>
    %84 = vector.extract_strided_slice %64 {offsets = [0, 4], sizes = [16, 28], strides = [1, 1]} : vector<16x32xf32> to vector<16x28xf32>
    %85 = vector.extract_strided_slice %64 {offsets = [0, 0], sizes = [16, 4], strides = [1, 1]} : vector<16x32xf32> to vector<16x4xf32>
    %86 = tpu.concatenate %84, %85 in 1 : vector<16x28xf32>, vector<16x4xf32> -> vector<16x32xf32>
    %87 = vector.shape_cast %83 : vector<1x32xi1> to vector<1x32xi1>
    %88 = vector.broadcast %87 : vector<1x32xi1> to vector<16x32xi1>
    %89 = arith.select %88, %86, %64 : vector<16x32xi1>, vector<16x32xf32>
    %90 = vector.extract_strided_slice %70 {offsets = [0, 4], sizes = [16, 28], strides = [1, 1]} : vector<16x32xf32> to vector<16x28xf32>
    %91 = vector.extract_strided_slice %70 {offsets = [0, 0], sizes = [16, 4], strides = [1, 1]} : vector<16x32xf32> to vector<16x4xf32>
    %92 = tpu.concatenate %90, %91 in 1 : vector<16x28xf32>, vector<16x4xf32> -> vector<16x32xf32>
    %93 = vector.shape_cast %83 : vector<1x32xi1> to vector<1x32xi1>
    %94 = vector.broadcast %93 : vector<1x32xi1> to vector<16x32xi1>
    %95 = arith.select %94, %92, %70 : vector<16x32xi1>, vector<16x32xf32>
    %96 = vector.extract_strided_slice %89 {offsets = [0, 0], sizes = [16, 8], strides = [1, 1]} : vector<16x32xf32> to vector<16x8xf32>
    %cst = arith.constant 2.500000e-01 : f32
    %97 = vector.broadcast %cst : f32 to vector<16x8xf32>
    %98 = arith.mulf %96, %97 : vector<16x8xf32>
    %c0_17 = arith.constant 0 : index
    %c0_18 = arith.constant 0 : index
    %99 = vector.load %arg4[%c0_17, %c0_18] : memref<16x8xf32, #tpu.memory_space<vmem>>, vector<16x8xf32>
    tpu.vector_store %arg4[%c0_17, %c0_18], %98 {strides = array<i32>} : memref<16x8xf32, #tpu.memory_space<vmem>>, vector<16x8xf32>,
    %100 = vector.extract_strided_slice %95 {offsets = [0, 0], sizes = [16, 8], strides = [1, 1]} : vector<16x32xf32> to vector<16x8xf32>
    %c0_19 = arith.constant 0 : index
    %c0_20 = arith.constant 0 : index
    %101 = vector.load %arg3[%c0_19, %c0_20] : memref<16x8xf32, #tpu.memory_space<vmem>>, vector<16x8xf32>
    tpu.vector_store %arg3[%c0_19, %c0_20], %100 {strides = array<i32>} : memref<16x8xf32, #tpu.memory_space<vmem>>, vector<16x8xf32>,
    return
  }
  func.func @transform_0(%arg0: i32) -> (i32, i32) {
    %c0_i32 = arith.constant 0 : i32
    %c0_i32_0 = arith.constant 0 : i32
    return %arg0, %c0_i32 : i32, i32
  }
  func.func @transform_1(%arg0: i32) -> (i32, i32) {
    %c0_i32 = arith.constant 0 : i32
    %c0_i32_0 = arith.constant 0 : i32
    return %arg0, %c0_i32 : i32, i32
  }
  func.func @transform_2(%arg0: i32) -> (i32, i32) {
    %c0_i32 = arith.constant 0 : i32
    %c0_i32_0 = arith.constant 0 : i32
    return %arg0, %c0_i32 : i32, i32
  }
  func.func @transform_3(%arg0: i32) -> (i32, i32) {
    %c0_i32 = arith.constant 0 : i32
    %c0_i32_0 = arith.constant 0 : i32
    return %arg0, %c0_i32 : i32, i32
  }
}

</mosaic_0001>

<bundles_post_ra>
// kernel: tpu_custom_call.1
= control target key start
LH: loop header
LB: loop body
LE: loop exit
PB: predicated region body
PF: predicated region fallthrough
CT: control target
= control target key end

     0   :  { %s602_s12 = smov 0   ;;  %s715_s0 = inlined_call_operand.vmem [shape: f32[64,32], index: 0, kind: input, shape index: {}]   ;;  %s716_s1 = inlined_call_operand.vmem [shape: f32[64,32], index: 1, kind: input, shape index: {}]   ;;  %s717_s2 = inlined_call_operand.vmem [shape: f32[64,8], index: 2, kind: output, shape index: {0}]   ;;  %s718_s3 = inlined_call_operand.vmem [shape: f32[64,8], index: 3, kind: output, shape index: {1}]  }
   0x1 LB: > { %s535_s13 = sadd.s32 4294967295, %s572_s12   ;;  %p539_p0 = scmp.ge.s32.totalorder %s572_s12, 1  ;;  %s572_s12 = sphi %s602_s12, %s14_s12  }
   0x2   : > { %p152_p1 = scmp.lt.s32.totalorder %s572_s12, 5 }
   0x4   : > { %p153_p2 = pnand %p539_p0, %p152_p1 }
   0x5   : > { %s540_s14 = sshll.u32 (!%p153_p2), %s535_s13, 1  ;;  %s574_s19 = smov (!%p153_p2), 127   ;;  %vm228_vm0 = vcmask (!%p153_p2), 252928   ;;  %vm267_vm3 = vcmask (!%p153_p2), 130048   ;;  %v292_v36 = vlaneseq (!%p153_p2)  ;;  %vm357_vm11 = vcmask (!%p153_p2), 244736  }
   0x6   : > { %156 = sbr.rel (%p153_p2) target bundleno = 621 (0x26d), region = 28  ;;  %p187_p3 = scmp.lt.s32.totalorder (!%p153_p2), %s540_s14, 7  ;;  %vm401_vm15 = vcmask (!%p153_p2), 228352  }
   0x7   : > { %s575_s23 = smov (!%p153_p2), 31   ;;  %s576_s24 = smov (!%p153_p2), 16   ;;  %v646_v37 = vand.u32 (!%p153_p2), 127, %v292_v36 }
   0x8   : > { %s577_s25 = smov (!%p153_p2), 112   ;;  %s578_s26 = smov (!%p153_p2), 30  }
   0x9   : > { %v296_v38 = vshra.s32 (!%p153_p2), %v646_v37, 1  ;;  %v294_v39 = vand.u32 (!%p153_p2), 1, %v646_v37  ;;  %s579_s27 = smov (!%p153_p2), 126   ;;  %v339_v58 = vshra.s32 (!%p153_p2), %v646_v37, 2  ;;  %s580_s28 = smov (!%p153_p2), 28  }
   0xa   : > { %s581_s29 = smov (!%p153_p2), 124  }
   0xb   : > { %v297_v40 = vand.u32 (!%p153_p2), 1, %v296_v38  ;;  %vm295_vm6 = vcmp.eq.s32.totalorder (!%p153_p2), %v294_v39, 1  ;;  %v340_v59 = vand.u32 (!%p153_p2), 1, %v339_v58 }
   0xd   : > { %s726_s14 = smov (!%p187_p3, %s540_s14), 7  ;;  %vm298_vm7 = vcmp.eq.s32.totalorder %v297_v40, 0  ;;  %vm338_vm9 = vcmp.eq.s32.totalorder %v297_v40, 1  ;;  %vm341_vm10 = vcmp.eq.s32.totalorder %v340_v59, 0  ;;  %vm382_vm13 = vcmp.eq.s32.totalorder %v340_v59, 1 }
   0xe   : > { %s610_s15 = sshll.u32 %s726_s14, 3  ;;  %vm650_vm8 = vmand %vm295_vm6, %vm298_vm7 }
   0xf   : > { %s196_s18 = scalar_lea.vmem %s716_s1, %s610_s15  ;;  %s190_s22 = scalar_lea.vmem %s715_s0, %s610_s15  ;;  %vm667_vm12 = vmand %vm338_vm9, %vm341_vm10 }
  0x10   : > { %v213_v0 = vld [vmem:[%s196_s18 + $0x8] sm:$0xff]  ;;  %v212_v1 = vld [vmem:[%s196_s18] sm:$0xff]  ;;  %s208_s5 = scalar_lea.vmem %s718_s3, %s610_s15  ;;  %s202_s8 = scalar_lea.vmem %s717_s2, %s610_s15 }
  0x11   : > { %218 = vrot.lane.b32.xlu1 %v213_v0, %s574_s19  ;;  %216 = vrot.lane.b32.xlu0 %v212_v1, %s574_s19  ;;  %v210_v2 = vld [vmem:[%s190_s22] sm:$0xff]  ;;  %v211_v3 = vld [vmem:[%s190_s22 + $0x8] sm:$0xff] }
  0x15   : > { %224 = vrot.lane.b32.xlu1 %v213_v0, %s575_s23  ;;  %222 = vrot.lane.b32.xlu0 %v212_v1, %s575_s23 }
  0x19   : > { %239 = vrot.lane.b32.xlu1 %v210_v2, %s575_s23  ;;  %233 = vrot.lane.b32.xlu0 %v210_v2, %s574_s19 }
  0x1d   : > { %241 = vrot.lane.b32.xlu1 %v211_v3, %s575_s23  ;;  %235 = vrot.lane.b32.xlu0 %v211_v3, %s574_s19 }
  0x83   : > { %v219_v4 = vpop.permute.xlu1 %218  ;;  %v217_v5 = vpop.permute.xlu0 %216 }
  0x87   : > { %v225_v6 = vpop.permute.xlu1 %224  ;;  %v223_v7 = vpop.permute.xlu0 %222 }
  0x88   : > { %v230_v8 = vsel %vm228_vm0, %v219_v4, %v225_v6  ;;  %v229_v9 = vsel %vm228_vm0, %v217_v5, %v223_v7 }
  0x89   : > { %vm247_vm1 = vcmp.gt.f32.partialorder %v229_v9, %v212_v1  ;;  %vm248_vm2 = vcmp.gt.f32.partialorder %v230_v8, %v213_v0 }
  0x8a   : > { %v249_v10 = vsel %vm247_vm1, %v229_v9, %v212_v1  ;;  %v250_v13 = vsel %vm248_vm2, %v230_v8, %v213_v0 }
  0x8b   : > { %261 = vrot.lane.b32.xlu1 %v249_v10, %s576_s24  ;;  %v240_v11 = vpop.permute.xlu1 %239  ;;  %255 = vrot.lane.b32.xlu0 %v249_v10, %s577_s25  ;;  %v234_v12 = vpop.permute.xlu0 %233 }
  0x8c   : > { %v245_v14 = vsel %vm228_vm0, %v234_v12, %v240_v11 }
  0x8d   : > { %v251_v17 = vsel %vm247_vm1, %v245_v14, %v210_v2  ;;  %vm428_vm1 = vcmask 64512  }
  0x8f   : > { %263 = vrot.lane.b32.xlu1 %v250_v13, %s576_s24  ;;  %257 = vrot.lane.b32.xlu0 %v250_v13, %s577_s25  ;;  %v242_v15 = vpop.permute.xlu1 %241  ;;  %v236_v16 = vpop.permute.xlu0 %235 }
  0x90   : > { %v246_v18 = vsel %vm228_vm0, %v236_v16, %v242_v15 }
  0x91   : > { %v252_v19 = vsel %vm248_vm2, %v246_v18, %v211_v3 }
  0x93   : > { %278 = vrot.lane.b32.xlu1 %v251_v17, %s576_s24  ;;  %272 = vrot.lane.b32.xlu0 %v251_v17, %s577_s25 }
  0x97   : > { %280 = vrot.lane.b32.xlu1 %v252_v19, %s576_s24  ;;  %274 = vrot.lane.b32.xlu0 %v252_v19, %s577_s25 }
  0xfd   : > { %v262_v20 = vpop.permute.xlu1 %261  ;;  %v256_v21 = vpop.permute.xlu0 %255 }
  0xfe   : > { %v268_v22 = vsel %vm267_vm3, %v256_v21, %v262_v20 }
  0xff   : > { %vm286_vm4 = vcmp.gt.f32.partialorder %v268_v22, %v249_v10 }
 0x100   : > { %v288_v23 = vsel %vm286_vm4, %v268_v22, %v249_v10 }
 0x101   : > { %v264_v24 = vpop.permute.xlu1 %263  ;;  %308 = vrot.lane.b32.xlu1 %v288_v23, %s575_s23  ;;  %302 = vrot.lane.b32.xlu0 %v288_v23, %s574_s19  ;;  %v258_v25 = vpop.permute.xlu0 %257 }
 0x102   : > { %v269_v26 = vsel %vm267_vm3, %v258_v25, %v264_v24 }
 0x103   : > { %vm287_vm5 = vcmp.gt.f32.partialorder %v269_v26, %v250_v13 }
 0x104   : > { %v289_v27 = vsel %vm287_vm5, %v269_v26, %v250_v13  ;;  %v383_v13 = vshra.s32 %v646_v37, 3 }
 0x105   : > { %v279_v28 = vpop.permute.xlu1 %278  ;;  %310 = vrot.lane.b32.xlu1 %v289_v27, %s575_s23  ;;  %304 = vrot.lane.b32.xlu0 %v289_v27, %s574_s19  ;;  %v273_v29 = vpop.permute.xlu0 %272 }
 0x106   : > { %v284_v30 = vsel %vm267_vm3, %v273_v29, %v279_v28  ;;  %v384_v14 = vand.u32 1, %v383_v13 }
 0x107   : > { %v290_v31 = vsel %vm286_vm4, %v284_v30, %v251_v17 }
 0x108   : > { %vm385_vm14 = vcmp.eq.s32.totalorder %v384_v14, 0 }
 0x109   : > { %v281_v32 = vpop.permute.xlu1 %280  ;;  %328 = vrot.lane.b32.xlu1 %v290_v31, %s575_s23  ;;  %322 = vrot.lane.b32.xlu0 %v290_v31, %s574_s19  ;;  %v275_v33 = vpop.permute.xlu0 %274 }
 0x10a   : > { %v285_v34 = vsel %vm267_vm3, %v275_v33, %v281_v32 }
 0x10b   : > { %v291_v35 = vsel %vm287_vm5, %v285_v34, %v252_v19 }
 0x10d   : > { %330 = vrot.lane.b32.xlu1 %v291_v35, %s575_s23  ;;  %324 = vrot.lane.b32.xlu0 %v291_v35, %s574_s19 }
 0x173   : > { %v309_v42 = vpop.permute.xlu1 %308  ;;  %v303_v43 = vpop.permute.xlu0 %302 }
 0x174   : > { %v314_v44 = vsel %vm228_vm0, %v303_v43, %v309_v42 }
 0x175   : > { %v318_v45 = vsel %vm650_vm8, %v314_v44, %v288_v23 }
 0x176   : > { %351 = vrot.lane.b32.xlu1 %v318_v45, %s578_s26  ;;  %345 = vrot.lane.b32.xlu0 %v318_v45, %s579_s27 }
 0x177   : > { %v311_v46 = vpop.permute.xlu1 %310  ;;  %v305_v47 = vpop.permute.xlu0 %304 }
 0x178   : > { %v315_v48 = vsel %vm228_vm0, %v305_v47, %v311_v46 }
 0x179   : > { %v319_v49 = vsel %vm650_vm8, %v315_v48, %v289_v27 }
 0x17a   : > { %353 = vrot.lane.b32.xlu1 %v319_v49, %s578_s26  ;;  %347 = vrot.lane.b32.xlu0 %v319_v49, %s579_s27 }
 0x17b   : > { %v329_v50 = vpop.permute.xlu1 %328  ;;  %v323_v51 = vpop.permute.xlu0 %322 }
 0x17c   : > { %v334_v52 = vsel %vm228_vm0, %v323_v51, %v329_v50 }
 0x17d   : > { %v336_v53 = vsel %vm650_vm8, %v334_v52, %v290_v31 }
 0x17e   : > { %372 = vrot.lane.b32.xlu1 %v336_v53, %s578_s26  ;;  %366 = vrot.lane.b32.xlu0 %v336_v53, %s579_s27 }
 0x17f   : > { %v331_v54 = vpop.permute.xlu1 %330  ;;  %v325_v55 = vpop.permute.xlu0 %324 }
 0x180   : > { %v335_v56 = vsel %vm228_vm0, %v325_v55, %v331_v54  ;;  %vm684_vm0 = vmand %vm382_vm13, %vm385_vm14 }
 0x181   : > { %v337_v57 = vsel %vm650_vm8, %v335_v56, %v291_v35 }
 0x182   : > { %374 = vrot.lane.b32.xlu1 %v337_v57, %s578_s26  ;;  %368 = vrot.lane.b32.xlu0 %v337_v57, %s579_s27 }
 0x1e8   : > { %v352_v61 = vpop.permute.xlu1 %351  ;;  %v346_v62 = vpop.permute.xlu0 %345 }
 0x1e9   : > { %v358_v63 = vsel %vm357_vm11, %v346_v62, %v352_v61 }
 0x1ea   : > { %v362_v0 = vsel %vm667_vm12, %v358_v63, %v318_v45 }
 0x1eb   : > { %395 = vrot.lane.b32.xlu1 %v362_v0, %s580_s28  ;;  %389 = vrot.lane.b32.xlu0 %v362_v0, %s581_s29 }
 0x1ec   : > { %v354_v1 = vpop.permute.xlu1 %353  ;;  %v348_v2 = vpop.permute.xlu0 %347 }
 0x1ed   : > { %v359_v3 = vsel %vm357_vm11, %v348_v2, %v354_v1 }
 0x1ee   : > { %v363_v4 = vsel %vm667_vm12, %v359_v3, %v319_v49 }
 0x1ef   : > { %397 = vrot.lane.b32.xlu1 %v363_v4, %s580_s28  ;;  %391 = vrot.lane.b32.xlu0 %v363_v4, %s581_s29 }
 0x1f0   : > { %v373_v5 = vpop.permute.xlu1 %372  ;;  %v367_v6 = vpop.permute.xlu0 %366 }
 0x1f1   : > { %v378_v7 = vsel %vm357_vm11, %v367_v6, %v373_v5 }
 0x1f2   : > { %v380_v8 = vsel %vm667_vm12, %v378_v7, %v336_v53 }
 0x1f3   : > { %416 = vrot.lane.b32.xlu1 %v380_v8, %s580_s28  ;;  %410 = vrot.lane.b32.xlu0 %v380_v8, %s581_s29 }
 0x1f4   : > { %v375_v9 = vpop.permute.xlu1 %374  ;;  %v369_v10 = vpop.permute.xlu0 %368 }
 0x1f5   : > { %v379_v11 = vsel %vm357_vm11, %v369_v10, %v375_v9 }
 0x1f6   : > { %v381_v12 = vsel %vm667_vm12, %v379_v11, %v337_v57 }
 0x1f7   : > { %418 = vrot.lane.b32.xlu1 %v381_v12, %s580_s28  ;;  %412 = vrot.lane.b32.xlu0 %v381_v12, %s581_s29 }
 0x25d   : > { %v396_v16 = vpop.permute.xlu1 %395  ;;  %v390_v17 = vpop.permute.xlu0 %389 }
 0x25e   : > { %v402_v18 = vsel %vm401_vm15, %v390_v17, %v396_v16 }
 0x25f   : > { %v406_v19 = vsel %vm684_vm0, %v402_v18, %v362_v0 }
 0x260   : > { %v426_v20 = vmul.f32 0.25, %v406_v19 }
 0x261   : > { %v398_v21 = vpop.permute.xlu1 %397  ;;  %v392_v22 = vpop.permute.xlu0 %391 }
 0x262   : > { %429 = vst.msk [vmem:[%s208_s5] sm:$0xff] %vm428_vm1, %v426_v20  ;;  %v403_v23 = vsel %vm401_vm15, %v392_v22, %v398_v21 }
 0x263   : > { %v407_v24 = vsel %vm684_vm0, %v403_v23, %v363_v4 }
 0x264   : > { %v427_v25 = vmul.f32 0.25, %v407_v24 }
 0x265   : > { %v417_v26 = vpop.permute.xlu1 %416  ;;  %v411_v27 = vpop.permute.xlu0 %410 }
 0x266   : > { %430 = vst.msk [vmem:[%s208_s5 + $0x8] sm:$0xff] %vm428_vm1, %v427_v25  ;;  %v422_v28 = vsel %vm401_vm15, %v411_v27, %v417_v26 }
 0x267   : > { %v424_v29 = vsel %vm684_vm0, %v422_v28, %v380_v8 }
 0x268   : > { %431 = vst.msk [vmem:[%s202_s8] sm:$0xff] %vm428_vm1, %v424_v29 }
 0x269   : > { %v419_v30 = vpop.permute.xlu1 %418  ;;  %v413_v31 = vpop.permute.xlu0 %412 }
 0x26a   : > { %v423_v32 = vsel %vm401_vm15, %v413_v31, %v419_v30 }
 0x26b   : > { %v425_v33 = vsel %vm684_vm0, %v423_v32, %v381_v12 }
 0x26c   : > { %432 = vst.msk [vmem:[%s202_s8 + $0x8] sm:$0xff] %vm428_vm1, %v425_v33 }
 0x26d PF: > { %s14_s12 = sadd.s32 1, %s572_s12  }
 0x26e   : > { %p11_p4 = scmp.ge.s32.totalorder %s14_s12, 6  }
 0x270   :  { %13 = sbr.rel (!%p11_p4) target bundleno = 1 (0x1), region = 73 }

</bundles_post_ra>
